<compile_context>
chip_gen: v7x
topology: tpu7x:2x2x1
jax: 0.10.0
libtpu: 0.0.40
codegen_flags: <defaults>
</compile_context>

<pallas_src>
import functools

import numpy as np
import jax
import jax.numpy as jnp
from jax import lax
from jax.experimental import pallas as pl
from jax.experimental.pallas import tpu as pltpu

LANES = 128   # lane-dense packing target (last dim of every block)
HALO = 8      # leading / trailing zero rows (keeps halo reads in-bounds, 8-sublane aligned)


def _round_up(x, m):
    return (x + m - 1) // m * m


def _tap_slabs(w_hwio, W, lanes, mxu_dtype):
    """Per-vertical-tap block-Toeplitz slabs (3, lanes, lanes).

    slab[ky] maps the lane-packed activation row layout (w_in*Cin + c) to the
    lane-packed output layout (w*P + p); the horizontal zero padding (padding=1)
    is folded in structurally (out-of-range horizontal taps simply have no rows).
    Rows/cols beyond W*Cin / W*P are zero padding up to 128 lanes.
    """
    KH, KW, Cin, P = w_hwio.shape
    sel = np.zeros((KW, W, W), np.float32)   # sel[kx, w_in, w] = 1 iff w_in == w + kx - 1
    for kx in range(KW):
        for w in range(W):
            w_in = w + kx - 1
            if 0 <= w_in < W:
                sel[kx, w_in, w] = 1.0
    t = jnp.einsum('ykcp,kuw->yucwp', w_hwio.astype(jnp.float32), jnp.asarray(sel))
    t = t.reshape(KH, W * Cin, W * P)
    t = jnp.pad(t, ((0, 0), (0, lanes - W * Cin), (0, lanes - W * P)))
    return t.astype(mxu_dtype)


def prepare_params(w1_hwio, w2_hwio, scale1, bias1, scale2, bias2, W, *, use_bf16_mxu=False):
    """One-time weight prep: fold BN scale into conv weights, build per-tap Toeplitz slabs,
    tile/pad the BN biases to the lane-packed output layout.  Cache the result; it is
    constant for inference."""
    assert w1_hwio.shape[2] == w1_hwio.shape[3], "downsample=None requires inplanes == planes"
    P = w1_hwio.shape[-1]
    assert W * P <= LANES, "toy-shape path: W*C must fit one 128-lane group"
    mxu_dtype = jnp.bfloat16 if use_bf16_mxu else jnp.float32

    w1s = w1_hwio.astype(jnp.float32) * scale1.astype(jnp.float32)   # BN1 scale folded in
    w2s = w2_hwio.astype(jnp.float32) * scale2.astype(jnp.float32)   # BN2 scale folded in
    t1 = _tap_slabs(w1s, W, LANES, mxu_dtype)
    t2 = _tap_slabs(w2s, W, LANES, mxu_dtype)
    b1 = jnp.pad(jnp.tile(bias1.astype(jnp.float32), W), (0, LANES - W * P)).reshape(1, LANES)
    b2 = jnp.pad(jnp.tile(bias2.astype(jnp.float32), W), (0, LANES - W * P)).reshape(1, LANES)
    return t1, t2, b1, b2


def _basic_block_kernel(xslab_ref, t1_ref, t2_ref, b1_ref, b2_ref,
                        out_ref, y_ref, *, Hr, H):
    # xslab_ref : (M + 2*HALO, 128)  zero-padded lane-packed input, row g = HALO + b*Hr + h
    # t1/t2_ref : (3, 128, 128)      per-vertical-tap Toeplitz weights (BN scale folded in)
    # b1/b2_ref : (1, 128)           BN bias tiled over W, zero-padded lanes
    # out_ref   : (M, 128)           lane-packed output (dead rows discarded by the wrapper)
    # y_ref     : (M + 2*HALO, 128)  scratch: padded conv1 activation (same coords as xslab)
    M, lanes = out_ref.shape
    f32 = jnp.float32

    def conv(src_ref, t_ref):
        # output row r (global row g = HALO + r) reads src rows g-1, g, g+1:
        # 3 accumulated full-slab MXU matmuls, one per vertical tap.
        acc = jnp.dot(src_ref[pl.ds(HALO - 1, M), :], t_ref[0], preferred_element_type=f32)
        acc += jnp.dot(src_ref[pl.ds(HALO, M), :], t_ref[1], preferred_element_type=f32)
        acc += jnp.dot(src_ref[pl.ds(HALO + 1, M), :], t_ref[2], preferred_element_type=f32)
        return acc

    # rows that are real image rows (the rest are per-batch dead / halo rows)
    row = lax.broadcasted_iota(jnp.int32, (M, lanes), 0)
    valid = (row % Hr) < H

    # ---- conv1 (+ folded BN1) + bias + ReLU; halo/dead rows forced to exact zero ----
    y = jnp.maximum(conv(xslab_ref, t1_ref) + b1_ref[...], 0.0)
    y = jnp.where(valid, y, 0.0)

    # stash the padded conv1 activation: same row/lane coordinates as xslab, so the
    # interior is ONE aligned lane-dense store; only the leading/trailing halo rows
    # need an explicit zero fill (both 8-aligned).
    y_ref[pl.ds(0, HALO), :] = jnp.zeros((HALO, lanes), y_ref.dtype)
    y_ref[pl.ds(HALO + M, HALO), :] = jnp.zeros((HALO, lanes), y_ref.dtype)
    y_ref[pl.ds(HALO, M), :] = y.astype(y_ref.dtype)

    # ---- conv2 (+ folded BN2) + bias + residual + ReLU ----
    z = conv(y_ref, t2_ref) + b2_ref[...]
    identity = xslab_ref[pl.ds(HALO, M), :].astype(f32)   # C == P -> same lane layout
    out_ref[...] = jnp.maximum(z + identity, 0.0).astype(out_ref.dtype)


def basic_block(x_nchw, params):
    """x_nchw: (B, C, H, W) as in the PyTorch module; params from prepare_params().
    Returns NCHW (B, P, H, W)."""
    t1, t2, b1, b2 = params
    B, C, H, W = x_nchw.shape
    P = C
    assert W * C <= LANES, "toy-shape path: W*C must fit one 128-lane group"
    act_dtype = jnp.bfloat16 if t1.dtype == jnp.bfloat16 else jnp.float32

    Hr = _round_up(H + 2, 8)      # per-batch row pitch: image rows + halos, 8-aligned
    M = B * Hr                    # rows computed / stored by the kernel
    Rtot = M + 2 * HALO

    # ---- wrapper packing: NCHW -> lane-packed (w*C + c) rows, Hr-pitched zero-padded slab ----
    # TODO(synk): accept/return NHWC (or fuse this transpose into the producer) to avoid the
    # standalone XLA transpose HBM round trip of x.
    x_rows = jnp.transpose(x_nchw, (0, 2, 3, 1)).reshape(B, H, W * C).astype(act_dtype)
    blk = jnp.pad(x_rows, ((0, 0), (0, Hr - H), (0, LANES - W * C)))
    xslab = jnp.pad(blk.reshape(M, LANES), ((HALO, HALO), (0, 0)))

    # TODO(synk): for real ResNet shapes (W*C > 128, big H) or to use both v7x TensorCores,
    # add a leading "parallel" grid axis splitting B / H tiles and tile the lane dim; this
    # single-step, whole-slab path is sized (and VMEM-checked) for the toy shape only.
    grid_spec = pltpu.PrefetchScalarGridSpec(
        num_scalar_prefetch=0,
        grid=(1,),
        in_specs=[
            pl.BlockSpec((Rtot, LANES), lambda i: (0, 0)),
            pl.BlockSpec((3, LANES, LANES), lambda i: (0, 0, 0)),
            pl.BlockSpec((3, LANES, LANES), lambda i: (0, 0, 0)),
            pl.BlockSpec((1, LANES), lambda i: (0, 0)),
            pl.BlockSpec((1, LANES), lambda i: (0, 0)),
        ],
        out_specs=pl.BlockSpec((M, LANES), lambda i: (0, 0)),
        scratch_shapes=[pltpu.VMEM((Rtot, LANES), act_dtype)],
    )
    out2d = pl.pallas_call(
        functools.partial(_basic_block_kernel, Hr=Hr, H=H),
        out_shape=jax.ShapeDtypeStruct((M, LANES), x_nchw.dtype),
        grid_spec=grid_spec,
        compiler_params=pltpu.CompilerParams(dimension_semantics=("arbitrary",)),
    )(xslab, t1, t2, b1, b2)

    # unpack: drop dead rows / zero lanes, back to NCHW
    out = out2d.reshape(B, Hr, LANES)[:, :H, :W * P].reshape(B, H, W, P)
    return jnp.transpose(out, (0, 3, 1, 2))


def ref_forward(x_nchw, w1_hwio, w2_hwio, s1, b1, s2, b2):
    """Pure-JAX reference (NCHW activations, HWIO weights, SAME padding)."""
    dn = ("NCHW", "HWIO", "NCHW")
    y = lax.conv_general_dilated(x_nchw, w1_hwio, (1, 1), "SAME", dimension_numbers=dn)
    y = jnp.maximum(y * s1[None, :, None, None] + b1[None, :, None, None], 0.0)
    z = lax.conv_general_dilated(y, w2_hwio, (1, 1), "SAME", dimension_numbers=dn)
    z = z * s2[None, :, None, None] + b2[None, :, None, None] + x_nchw
    return jnp.maximum(z, 0.0)


if __name__ == "__main__":
    B, C, H, W = 2, 4, 16, 16      # inplanes = planes = 4, stride = 1, dilation = 1
    eps = 1e-5

    key = jax.random.PRNGKey(0)
    ks = jax.random.split(key, 10)
    x = jax.random.normal(ks[0], (B, C, H, W), jnp.float32)        # NCHW, like PyTorch

    # conv weights (HWIO), deterministic synthetic init
    w1 = 0.2 * jax.random.normal(ks[1], (3, 3, C, C), jnp.float32)
    w2 = 0.2 * jax.random.normal(ks[2], (3, 3, C, C), jnp.float32)

    # BatchNorm (eval mode) params folded into per-channel scale/bias
    gamma1 = 1.0 + 0.1 * jax.random.normal(ks[3], (C,), jnp.float32)
    beta1 = 0.1 * jax.random.normal(ks[4], (C,), jnp.float32)
    mean1 = 0.1 * jax.random.normal(ks[5], (C,), jnp.float32)
    var1 = 1.0 + 0.1 * jax.random.uniform(ks[6], (C,), jnp.float32)
    gamma2 = 1.0 + 0.1 * jax.random.normal(ks[7], (C,), jnp.float32)
    beta2 = 0.1 * jax.random.normal(ks[8], (C,), jnp.float32)
    mean2 = 0.1 * jax.random.normal(ks[9], (C,), jnp.float32)
    var2 = jnp.ones((C,), jnp.float32)

    scale1 = gamma1 / jnp.sqrt(var1 + eps)
    bias1 = beta1 - mean1 * scale1
    scale2 = gamma2 / jnp.sqrt(var2 + eps)
    bias2 = beta2 - mean2 * scale2

    ref = ref_forward(x, w1, w2, scale1, bias1, scale2, bias2)

    # exact path (f32 MXU operands) — weight prep hoisted and done once
    params_f32 = prepare_params(w1, w2, scale1, bias1, scale2, bias2, W, use_bf16_mxu=False)
    out = jax.block_until_ready(basic_block(x, params_f32))
    np.testing.assert_allclose(np.asarray(out), np.asarray(ref), rtol=1e-4, atol=1e-4)

    # bf16 fast path (bf16 activations + weights on the MXU, f32 accumulate / f32 epilogue).
    # Intended precision: ~1e-2 relative error vs the f32 reference.
    params_bf16 = prepare_params(w1, w2, scale1, bias1, scale2, bias2, W, use_bf16_mxu=True)
    out_bf16 = jax.block_until_ready(basic_block(x, params_bf16))
    np.testing.assert_allclose(np.asarray(out_bf16), np.asarray(ref), rtol=5e-2, atol=5e-2)

    print("KERNEL_OK")
</pallas_src>

<mosaic_0001>
module attributes {stable_mosaic.version = 11 : i64} {
  func.func @_basic_block_kernel(%arg0: i32, %arg1: memref<64x128xf32, #tpu.memory_space<vmem>>, %arg2: memref<3x128x128xf32, #tpu.memory_space<vmem>>, %arg3: memref<3x128x128xf32, #tpu.memory_space<vmem>>, %arg4: memref<1x128xf32, #tpu.memory_space<vmem>>, %arg5: memref<1x128xf32, #tpu.memory_space<vmem>>, %arg6: memref<48x128xf32, #tpu.memory_space<vmem>>, %arg7: memref<64x128xf32, #tpu.memory_space<vmem>>) attributes {dimension_semantics = [#tpu.dimension_semantics<arbitrary>], iteration_bounds = array<i64: 1>, scalar_prefetch = 0 : i64, scratch_operands = 1 : i64, tpu.core_type = #tpu.core_type<tc>, window_params = [{pipeline_mode = #tpu.pipeline_mode<synchronous>, transform_indices = @transform_0, window_bounds = array<i64: 64, 128>}, {pipeline_mode = #tpu.pipeline_mode<synchronous>, transform_indices = @transform_1, window_bounds = array<i64: 3, 128, 128>}, {pipeline_mode = #tpu.pipeline_mode<synchronous>, transform_indices = @transform_2, window_bounds = array<i64: 3, 128, 128>}, {pipeline_mode = #tpu.pipeline_mode<synchronous>, transform_indices = @transform_3, window_bounds = array<i64: 1, 128>}, {pipeline_mode = #tpu.pipeline_mode<synchronous>, transform_indices = @transform_4, window_bounds = array<i64: 1, 128>}, {pipeline_mode = #tpu.pipeline_mode<synchronous>, transform_indices = @transform_5, window_bounds = array<i64: 48, 128>}]} {
    %0 = tpu.iota {dimensions = array<i32: 0>} : vector<48x128xi32>
    %c24_i32 = arith.constant 24 : i32
    %c0_i32 = arith.constant 0 : i32
    %1 = arith.cmpi eq, %c24_i32, %c0_i32 : i32
    %c1_i32 = arith.constant 1 : i32
    %2 = arith.select %1, %c1_i32, %c24_i32 : i32
    %3 = vector.broadcast %2 : i32 to vector<48x128xi32>
    %4 = arith.remsi %0, %3 : vector<48x128xi32>
    %c0_i32_0 = arith.constant 0 : i32
    %5 = vector.broadcast %c0_i32_0 : i32 to vector<48x128xi32>
    %6 = arith.cmpi ne, %4, %5 : vector<48x128xi32>
    %c0_i32_1 = arith.constant 0 : i32
    %7 = vector.broadcast %c0_i32_1 : i32 to vector<48x128xi32>
    %8 = arith.cmpi slt, %4, %7 : vector<48x128xi32>
    %c0_i32_2 = arith.constant 0 : i32
    %9 = arith.cmpi slt, %2, %c0_i32_2 : i32
    %10 = vector.broadcast %9 : i1 to vector<48x128xi1>
    %11 = vector.broadcast %10 : vector<48x128xi1> to vector<48x128xi1>
    %12 = arith.xori %8, %11 : vector<48x128xi1>
    %13 = arith.andi %12, %6 : vector<48x128xi1>
    %14 = vector.broadcast %2 : i32 to vector<48x128xi32>
    %15 = arith.addi %4, %14 : vector<48x128xi32>
    %16 = arith.select %13, %15, %4 : vector<48x128xi1>, vector<48x128xi32>
    %c16_i32 = arith.constant 16 : i32
    %17 = vector.broadcast %c16_i32 : i32 to vector<48x128xi32>
    %18 = arith.cmpi slt, %16, %17 : vector<48x128xi32>
    %c7 = arith.constant 7 : index
    %c0 = arith.constant 0 : index
    %19 = vector.load %arg1[%c7, %c0] : memref<64x128xf32, #tpu.memory_space<vmem>>, vector<48x128xf32>
    %c0_3 = arith.constant 0 : index
    %c0_4 = arith.constant 0 : index
    %c0_5 = arith.constant 0 : index
    %20 = vector.load %arg2[%c0_3, %c0_4, %c0_5] : memref<3x128x128xf32, #tpu.memory_space<vmem>>, vector<1x128x128xf32>
    %21 = vector.shape_cast %20 : vector<1x128x128xf32> to vector<128x128xf32>
    %cst = arith.constant dense<0.000000e+00> : vector<48x128xf32>
    %22 = tpu.matmul %19, %21, %cst {dimension_numbers = #tpu.dot_dimension_numbers<[1], [0], [0], [1], [0, 0, 1, 1], [], []>} : vector<48x128xf32>, vector<128x128xf32>, vector<48x128xf32> -> vector<48x128xf32>
    %c8 = arith.constant 8 : index
    %c0_6 = arith.constant 0 : index
    %23 = vector.load %arg1[%c8, %c0_6] : memref<64x128xf32, #tpu.memory_space<vmem>>, vector<48x128xf32>
    %c1 = arith.constant 1 : index
    %c0_7 = arith.constant 0 : index
    %c0_8 = arith.constant 0 : index
    %24 = vector.load %arg2[%c1, %c0_7, %c0_8] : memref<3x128x128xf32, #tpu.memory_space<vmem>>, vector<1x128x128xf32>
    %25 = vector.shape_cast %24 : vector<1x128x128xf32> to vector<128x128xf32>
    %cst_9 = arith.constant dense<0.000000e+00> : vector<48x128xf32>
    %26 = tpu.matmul %23, %25, %cst_9 {dimension_numbers = #tpu.dot_dimension_numbers<[1], [0], [0], [1], [0, 0, 1, 1], [], []>} : vector<48x128xf32>, vector<128x128xf32>, vector<48x128xf32> -> vector<48x128xf32>
    %27 = arith.addf %22, %26 : vector<48x128xf32>
    %c9 = arith.constant 9 : index
    %c0_10 = arith.constant 0 : index
    %28 = vector.load %arg1[%c9, %c0_10] : memref<64x128xf32, #tpu.memory_space<vmem>>, vector<48x128xf32>
    %c2 = arith.constant 2 : index
    %c0_11 = arith.constant 0 : index
    %c0_12 = arith.constant 0 : index
    %29 = vector.load %arg2[%c2, %c0_11, %c0_12] : memref<3x128x128xf32, #tpu.memory_space<vmem>>, vector<1x128x128xf32>
    %30 = vector.shape_cast %29 : vector<1x128x128xf32> to vector<128x128xf32>
    %cst_13 = arith.constant dense<0.000000e+00> : vector<48x128xf32>
    %31 = tpu.matmul %28, %30, %cst_13 {dimension_numbers = #tpu.dot_dimension_numbers<[1], [0], [0], [1], [0, 0, 1, 1], [], []>} : vector<48x128xf32>, vector<128x128xf32>, vector<48x128xf32> -> vector<48x128xf32>
    %32 = arith.addf %27, %31 : vector<48x128xf32>
    %c0_14 = arith.constant 0 : index
    %c0_15 = arith.constant 0 : index
    %33 = vector.load %arg4[%c0_14, %c0_15] : memref<1x128xf32, #tpu.memory_space<vmem>>, vector<1x128xf32>
    %34 = vector.broadcast %33 : vector<1x128xf32> to vector<48x128xf32>
    %35 = arith.addf %32, %34 : vector<48x128xf32>
    %cst_16 = arith.constant 0.000000e+00 : f32
    %36 = vector.broadcast %cst_16 : f32 to vector<48x128xf32>
    %37 = arith.maximumf %35, %36 : vector<48x128xf32>
    %cst_17 = arith.constant 0.000000e+00 : f32
    %38 = vector.broadcast %cst_17 : f32 to vector<48x128xf32>
    %39 = arith.select %18, %37, %38 : vector<48x128xi1>, vector<48x128xf32>
    %cst_18 = arith.constant 0.000000e+00 : f32
    %40 = vector.broadcast %cst_18 : f32 to vector<8x128xf32>
    %c0_19 = arith.constant 0 : index
    %c0_20 = arith.constant 0 : index
    %41 = vector.load %arg7[%c0_19, %c0_20] : memref<64x128xf32, #tpu.memory_space<vmem>>, vector<8x128xf32>
    tpu.vector_store %arg7[%c0_19, %c0_20], %40 {strides = array<i32>} : memref<64x128xf32, #tpu.memory_space<vmem>>, vector<8x128xf32>,
    %cst_21 = arith.constant 0.000000e+00 : f32
    %42 = vector.broadcast %cst_21 : f32 to vector<8x128xf32>
    %c56 = arith.constant 56 : index
    %c0_22 = arith.constant 0 : index
    %43 = vector.load %arg7[%c56, %c0_22] : memref<64x128xf32, #tpu.memory_space<vmem>>, vector<8x128xf32>
    tpu.vector_store %arg7[%c56, %c0_22], %42 {strides = array<i32>} : memref<64x128xf32, #tpu.memory_space<vmem>>, vector<8x128xf32>,
    %c8_23 = arith.constant 8 : index
    %c0_24 = arith.constant 0 : index
    %44 = vector.load %arg7[%c8_23, %c0_24] : memref<64x128xf32, #tpu.memory_space<vmem>>, vector<48x128xf32>
    tpu.vector_store %arg7[%c8_23, %c0_24], %39 {strides = array<i32>} : memref<64x128xf32, #tpu.memory_space<vmem>>, vector<48x128xf32>,
    %c7_25 = arith.constant 7 : index
    %c0_26 = arith.constant 0 : index
    %45 = vector.load %arg7[%c7_25, %c0_26] : memref<64x128xf32, #tpu.memory_space<vmem>>, vector<48x128xf32>
    %c0_27 = arith.constant 0 : index
    %c0_28 = arith.constant 0 : index
    %c0_29 = arith.constant 0 : index
    %46 = vector.load %arg3[%c0_27, %c0_28, %c0_29] : memref<3x128x128xf32, #tpu.memory_space<vmem>>, vector<1x128x128xf32>
    %47 = vector.shape_cast %46 : vector<1x128x128xf32> to vector<128x128xf32>
    %cst_30 = arith.constant dense<0.000000e+00> : vector<48x128xf32>
    %48 = tpu.matmul %45, %47, %cst_30 {dimension_numbers = #tpu.dot_dimension_numbers<[1], [0], [0], [1], [0, 0, 1, 1], [], []>} : vector<48x128xf32>, vector<128x128xf32>, vector<48x128xf32> -> vector<48x128xf32>
    %c8_31 = arith.constant 8 : index
    %c0_32 = arith.constant 0 : index
    %49 = vector.load %arg7[%c8_31, %c0_32] : memref<64x128xf32, #tpu.memory_space<vmem>>, vector<48x128xf32>
    %c1_33 = arith.constant 1 : index
    %c0_34 = arith.constant 0 : index
    %c0_35 = arith.constant 0 : index
    %50 = vector.load %arg3[%c1_33, %c0_34, %c0_35] : memref<3x128x128xf32, #tpu.memory_space<vmem>>, vector<1x128x128xf32>
    %51 = vector.shape_cast %50 : vector<1x128x128xf32> to vector<128x128xf32>
    %cst_36 = arith.constant dense<0.000000e+00> : vector<48x128xf32>
    %52 = tpu.matmul %49, %51, %cst_36 {dimension_numbers = #tpu.dot_dimension_numbers<[1], [0], [0], [1], [0, 0, 1, 1], [], []>} : vector<48x128xf32>, vector<128x128xf32>, vector<48x128xf32> -> vector<48x128xf32>
    %53 = arith.addf %48, %52 : vector<48x128xf32>
    %c9_37 = arith.constant 9 : index
    %c0_38 = arith.constant 0 : index
    %54 = vector.load %arg7[%c9_37, %c0_38] : memref<64x128xf32, #tpu.memory_space<vmem>>, vector<48x128xf32>
    %c2_39 = arith.constant 2 : index
    %c0_40 = arith.constant 0 : index
    %c0_41 = arith.constant 0 : index
    %55 = vector.load %arg3[%c2_39, %c0_40, %c0_41] : memref<3x128x128xf32, #tpu.memory_space<vmem>>, vector<1x128x128xf32>
    %56 = vector.shape_cast %55 : vector<1x128x128xf32> to vector<128x128xf32>
    %cst_42 = arith.constant dense<0.000000e+00> : vector<48x128xf32>
    %57 = tpu.matmul %54, %56, %cst_42 {dimension_numbers = #tpu.dot_dimension_numbers<[1], [0], [0], [1], [0, 0, 1, 1], [], []>} : vector<48x128xf32>, vector<128x128xf32>, vector<48x128xf32> -> vector<48x128xf32>
    %58 = arith.addf %53, %57 : vector<48x128xf32>
    %c0_43 = arith.constant 0 : index
    %c0_44 = arith.constant 0 : index
    %59 = vector.load %arg5[%c0_43, %c0_44] : memref<1x128xf32, #tpu.memory_space<vmem>>, vector<1x128xf32>
    %60 = vector.broadcast %59 : vector<1x128xf32> to vector<48x128xf32>
    %61 = arith.addf %58, %60 : vector<48x128xf32>
    %c8_45 = arith.constant 8 : index
    %c0_46 = arith.constant 0 : index
    %62 = vector.load %arg1[%c8_45, %c0_46] : memref<64x128xf32, #tpu.memory_space<vmem>>, vector<48x128xf32>
    %63 = arith.addf %61, %62 : vector<48x128xf32>
    %cst_47 = arith.constant 0.000000e+00 : f32
    %64 = vector.broadcast %cst_47 : f32 to vector<48x128xf32>
    %65 = arith.maximumf %63, %64 : vector<48x128xf32>
    %c0_48 = arith.constant 0 : index
    %c0_49 = arith.constant 0 : index
    %66 = vector.load %arg6[%c0_48, %c0_49] : memref<48x128xf32, #tpu.memory_space<vmem>>, vector<48x128xf32>
    tpu.vector_store %arg6[%c0_48, %c0_49], %65 {strides = array<i32>} : memref<48x128xf32, #tpu.memory_space<vmem>>, vector<48x128xf32>,
    return
  }
  func.func @transform_0(%arg0: i32) -> (i32, i32) {
    %c0_i32 = arith.constant 0 : i32
    %c0_i32_0 = arith.constant 0 : i32
    %c0_i32_1 = arith.constant 0 : i32
    return %c0_i32, %c0_i32_0 : i32, i32
  }
  func.func @transform_1(%arg0: i32) -> (i32, i32, i32) {
    %c0_i32 = arith.constant 0 : i32
    %c0_i32_0 = arith.constant 0 : i32
    %c0_i32_1 = arith.constant 0 : i32
    %c0_i32_2 = arith.constant 0 : i32
    return %c0_i32, %c0_i32_0, %c0_i32_1 : i32, i32, i32
  }
  func.func @transform_2(%arg0: i32) -> (i32, i32, i32) {
    %c0_i32 = arith.constant 0 : i32
    %c0_i32_0 = arith.constant 0 : i32
    %c0_i32_1 = arith.constant 0 : i32
    %c0_i32_2 = arith.constant 0 : i32
    return %c0_i32, %c0_i32_0, %c0_i32_1 : i32, i32, i32
  }
  func.func @transform_3(%arg0: i32) -> (i32, i32) {
    %c0_i32 = arith.constant 0 : i32
    %c0_i32_0 = arith.constant 0 : i32
    %c0_i32_1 = arith.constant 0 : i32
    return %c0_i32, %c0_i32_0 : i32, i32
  }
  func.func @transform_4(%arg0: i32) -> (i32, i32) {
    %c0_i32 = arith.constant 0 : i32
    %c0_i32_0 = arith.constant 0 : i32
    %c0_i32_1 = arith.constant 0 : i32
    return %c0_i32, %c0_i32_0 : i32, i32
  }
  func.func @transform_5(%arg0: i32) -> (i32, i32) {
    %c0_i32 = arith.constant 0 : i32
    %c0_i32_0 = arith.constant 0 : i32
    %c0_i32_1 = arith.constant 0 : i32
    return %c0_i32, %c0_i32_0 : i32, i32
  }
}

</mosaic_0001>

<bundles_post_ra>
// kernel: tpu_custom_call.1
= control target key start
LH: loop header
LB: loop body
LE: loop exit
PB: predicated region body
PF: predicated region fallthrough
CT: control target
= control target key end

     0   :  { %10 = vsyncpa [#allocation4], 0  ;;  %s1933_s0 = inlined_call_operand.hbm [shape: f32[64,128], index: 0, kind: input, shape index: {}]   ;;  %s1934_s1 = inlined_call_operand.hbm [shape: f32[3,128,128], index: 1, kind: input, shape index: {}]   ;;  %s1935_s2 = inlined_call_operand.hbm [shape: f32[3,128,128], index: 2, kind: input, shape index: {}]   ;;  %s1936_s3 = inlined_call_operand.vmem [shape: f32[1,128], index: 3, kind: input, shape index: {}]   ;;  %s1937_s4 = inlined_call_operand.vmem [shape: f32[1,128], index: 4, kind: input, shape index: {}]   ;;  %s1938_s5 = inlined_call_operand.hbm [shape: f32[48,128], index: 5, kind: output, shape index: {}]  }
   0x1   :  { %11 = vsyncpa [#allocation7], 0 }
   0x2   :  { %12 = vsyncpa [#allocation5], 0  ;;  %s1692_s18 = smov [#allocation6]   ;;  %s1693_s20 = smov [#allocation3]  }
   0x3   :  { %s30_s19 = sshll.u32 %s1692_s18, 4  ;;  %s18_s21 = sshll.u32 %s1693_s20, 4  ;;  %s31_s19 = int_to_ptr.vmem [resolvable:$true] %s30_s19  ;;  %s1729_s21 = int_to_ptr.vmem [resolvable:$true] %s18_s21 }
   0x4   :  { %s1598_s24 = scalar_lea.hbm %s1934_s1, 6144 }
   0x5   :  { %p1599_p0 = scmp.ne.s32.totalorder %s1934_s1, %s1598_s24  ;;  %p1602_p1 = scmp.lt.u32.totalorder %s1598_s24, %s1934_s1 }
   0x7   :  { %p1604_p2 = pnand %p1602_p1, %p1599_p0 }
   0x9   :  { %1607 = shalt.err (!%p1604_p2)
}
   0xa   :  { %s1608_s29 = scalar_lea.vmem %s31_s19, 6144  ;;  %p1613_p4 = scmp.lt.s32.totalorder %s31_s19, %s31_s19 }
   0xb   :  { %p1609_p3 = scmp.ne.s32.totalorder %s31_s19, %s1608_s29  ;;  %p1614_p5 = scmp.lt.s32.totalorder %s1608_s29, %s1608_s29 }
   0xd   :  { %p1615_p6 = por %p1614_p5, %p1613_p4 }
   0xf   :  { %p1616_p7 = pnand %p1615_p6, %p1609_p3 }
  0x11   :  { %1619 = shalt.err (!%p1616_p7)
}
  0x12   :  { %s1694_s30 = smov 128   ;;  %s1695_s6 = smov 8  }
  0x13   :  { %36 = dma.hbm_to_vmem [thread:$0]  %s1934_s1, 6144, %s31_s19, [#allocation7], %s1694_s30, %s1694_s30, %s1695_s6  }
  0x14   :  { %s1620_s11 = scalar_lea.hbm %s1933_s0, 1024 }
  0x15   :  { %p1621_p8 = scmp.ne.s32.totalorder %s1933_s0, %s1620_s11  ;;  %p1624_p9 = scmp.lt.u32.totalorder %s1620_s11, %s1933_s0 }
  0x17   :  { %p1626_p10 = pnand %p1624_p9, %p1621_p8 }
  0x19   :  { %1629 = shalt.err (!%p1626_p10)
}
  0x1a   :  { %s1630_s16 = scalar_lea.vmem %s1729_s21, 1024  ;;  %p1635_p12 = scmp.lt.s32.totalorder %s1729_s21, %s1729_s21 }
  0x1b   :  { %p1631_p11 = scmp.ne.s32.totalorder %s1729_s21, %s1630_s16  ;;  %p1636_p13 = scmp.lt.s32.totalorder %s1630_s16, %s1630_s16 }
  0x1d   :  { %p1637_p0 = por %p1636_p13, %p1635_p12 }
  0x1f   :  { %p1638_p1 = pnand %p1637_p0, %p1631_p11 }
  0x21   :  { %1641 = shalt.err (!%p1638_p1)
}
  0x22   :  { %24 = dma.hbm_to_vmem [thread:$0]  %s1933_s0, 1024, %s1729_s21, [#allocation4], %s1694_s30, %s1694_s30, %s1695_s6  }
  0x23   :  { %s1696_s18 = smov [#allocation8]   ;;  %s1642_s23 = scalar_lea.hbm %s1935_s2, 6144 }
  0x24   :  { %s42_s19 = sshll.u32 %s1696_s18, 4  ;;  %p1643_p2 = scmp.ne.s32.totalorder %s1935_s2, %s1642_s23  ;;  %s43_s19 = int_to_ptr.vmem [resolvable:$true] %s42_s19 }
  0x25   :  { %p1646_p3 = scmp.lt.u32.totalorder %s1642_s23, %s1935_s2 }
  0x27   :  { %p1648_p4 = pnand %p1646_p3, %p1643_p2 }
  0x29   :  { %1651 = shalt.err (!%p1648_p4)
}
  0x2a   :  { %s1652_s28 = scalar_lea.vmem %s43_s19, 6144  ;;  %p1657_p6 = scmp.lt.s32.totalorder %s43_s19, %s43_s19 }
  0x2b   :  { %p1653_p5 = scmp.ne.s32.totalorder %s43_s19, %s1652_s28  ;;  %p1658_p7 = scmp.lt.s32.totalorder %s1652_s28, %s1652_s28 }
  0x2d   :  { %p1659_p8 = por %p1658_p7, %p1657_p6 }
  0x2f   :  { %p1660_p9 = pnand %p1659_p8, %p1653_p5 }
  0x31   :  { %1663 = shalt.err (!%p1660_p9)
}
  0x32   :  { %48 = dma.hbm_to_vmem [thread:$0]  %s1935_s2, 6144, %s43_s19, [#allocation7], %s1694_s30, %s1694_s30, %s1695_s6  }
  0x33   :  { %1686 = dma.done.wait [#allocation4], 1024  }
  0x34   :  { %1687 = vsyncadd [#allocation4], 4294966272 }
  0x35   :  { %1688 = dma.done.wait [#allocation7], 12288  }
  0x36   :  { %1689 = vsyncadd [#allocation7], 4294955008  ;;  %v200_v0 = vld [vmem:[#allocation6 + $0x80] sm:$0xff]  ;;  %v201_v1 = vld [vmem:[#allocation6 + $0x88] sm:$0xff] }
  0x37   :  { %v202_v2 = vld [vmem:[#allocation6 + $0x90] sm:$0xff]  ;;  %v1357_v3 = vpack.c.bf16 %v201_v1, %v200_v0  ;;  %v203_v4 = vld [vmem:[#allocation6 + $0x98] sm:$0xff]  ;;  %v204_v6 = vld [vmem:[#allocation6 + $0xa0] sm:$0xff] }
  0x38   :  { %v1361_v5 = vpack.c.bf16 %v203_v4, %v202_v2  ;;  %v205_v7 = vld [vmem:[#allocation6 + $0xa8] sm:$0xff]  ;;  %v206_v10 = vld [vmem:[#allocation6 + $0xb0] sm:$0xff]  ;;  %v207_v11 = vld [vmem:[#allocation6 + $0xb8] sm:$0xff] }
  0x39   :  { %1358 = vmatprep.subr.bf16.mxu0 %v1357_v3  ;;  %v1365_v8 = vpack.c.bf16 %v205_v7, %v204_v6  ;;  %v1781_v9 = vld [vmem:[#allocation3 + $0x8] sm:$0xff]  ;;  %v1369_v12 = vpack.c.bf16 %v207_v11, %v206_v10  ;;  %v208_v13 = vld [vmem:[#allocation6 + $0xc0] sm:$0xff]  ;;  %v210_v16 = vld [vmem:[#allocation6 + $0xd0] sm:$0xff] }
  0x3a   :  { %1360 = vmatpush3.bf16.msra.mxu0 %v1357_v3  ;;  %1143 = vmatprep.mubr.f32.mxu0 %v1781_v9  ;;  %v209_v14 = vld [vmem:[#allocation6 + $0xc8] sm:$0xff]  ;;  %v211_v17 = vld [vmem:[#allocation6 + $0xd8] sm:$0xff]  ;;  %v212_v19 = vld [vmem:[#allocation6 + $0xe0] sm:$0xff] }
  0x3b   :  { %1362 = vmatprep.subr.bf16.mxu0 %v1361_v5  ;;  %v1373_v15 = vpack.c.bf16 %v209_v14, %v208_v13  ;;  %v1377_v18 = vpack.c.bf16 %v211_v17, %v210_v16  ;;  %v213_v20 = vld [vmem:[#allocation6 + $0xe8] sm:$0xff]  ;;  %v214_v22 = vld [vmem:[#allocation6 + $0xf0] sm:$0xff]  ;;  %v215_v23 = vld [vmem:[#allocation6 + $0xf8] sm:$0xff] }
  0x3c   :  { %v1381_v21 = vpack.c.bf16 %v213_v20, %v212_v19  ;;  %v592_v24 = vld [vmem:[#allocation8 + $0x80] sm:$0xff]  ;;  %v593_v25 = vld [vmem:[#allocation8 + $0x88] sm:$0xff]  ;;  %v594_v26 = vld [vmem:[#allocation8 + $0x90] sm:$0xff]  ;;  %v1385_v32 = vpack.c.bf16 %v215_v23, %v214_v22 }
  0x3d   :  { %v1453_v27 = vpack.c.bf16 %v593_v25, %v592_v24  ;;  %v595_v28 = vld [vmem:[#allocation8 + $0x98] sm:$0xff]  ;;  %v596_v30 = vld [vmem:[#allocation8 + $0xa0] sm:$0xff]  ;;  %v597_v31 = vld [vmem:[#allocation8 + $0xa8] sm:$0xff] }
  0x3e   :  { %1364 = vmatpush3.bf16.msra.mxu0 %v1361_v5  ;;  %v1457_v29 = vpack.c.bf16 %v595_v28, %v594_v26  ;;  %v177_v33 = vld [vmem:[#allocation6] sm:$0xff]  ;;  %v178_v34 = vld [vmem:[#allocation6 + $0x8] sm:$0xff]  ;;  %v1461_v35 = vpack.c.bf16 %v597_v31, %v596_v30  ;;  %v598_v36 = vld [vmem:[#allocation8 + $0xb0] sm:$0xff] }
  0x3f   :  { %1366 = vmatprep.subr.bf16.mxu0 %v1365_v8  ;;  %1454 = vmatprep.subr.bf16.mxu1 %v1453_v27  ;;  %v599_v37 = vld [vmem:[#allocation8 + $0xb8] sm:$0xff]  ;;  %v1389_v38 = vpack.c.bf16 %v178_v34, %v177_v33  ;;  %v179_v39 = vld [vmem:[#allocation6 + $0x10] sm:$0xff]  ;;  %v600_v43 = vld [vmem:[#allocation8 + $0xc0] sm:$0xff] }
  0x40   :  { %1456 = vmatpush3.bf16.msra.mxu1 %v1453_v27  ;;  %v180_v40 = vld [vmem:[#allocation6 + $0x18] sm:$0xff]  ;;  %v1465_v41 = vpack.c.bf16 %v599_v37, %v598_v36  ;;  %v1784_v42 = vld [vmem:[#allocation3 + $0x10] sm:$0xff]  ;;  %v601_v44 = vld [vmem:[#allocation8 + $0xc8] sm:$0xff] }
  0x41   :  { %1458 = vmatprep.subr.bf16.mxu1 %v1457_v29  ;;  %v1393_v45 = vpack.c.bf16 %v180_v40, %v179_v39  ;;  %v1786_v46 = vld [vmem:[#allocation3 + $0x18] sm:$0xff]  ;;  %v181_v47 = vld [vmem:[#allocation6 + $0x20] sm:$0xff]  ;;  %v182_v48 = vld [vmem:[#allocation6 + $0x28] sm:$0xff]  ;;  %v1469_v49 = vpack.c.bf16 %v601_v44, %v600_v43 }
  0x42   :  { %1368 = vmatpush3.bf16.msra.mxu0 %v1365_v8  ;;  %v1790_v50 = vld [vmem:[#allocation3 + $0x20] sm:$0xff]  ;;  %v1397_v51 = vpack.c.bf16 %v182_v48, %v181_v47  ;;  %v1792_v52 = vld [vmem:[#allocation3 + $0x28] sm:$0xff]  ;;  %v183_v53 = vld [vmem:[#allocation6 + $0x30] sm:$0xff] }
  0x43   :  { %1370 = vmatprep.subr.bf16.mxu0 %v1369_v12  ;;  %v184_v54 = vld [vmem:[#allocation6 + $0x38] sm:$0xff]  ;;  %v1796_v55 = vld [vmem:[#allocation3 + $0x30] sm:$0xff]  ;;  %v171_v57 = vld [vmem:[#allocation3 + $0x7] sm:$0xff] }
  0x44   :  { %1460 = vmatpush3.bf16.msra.mxu1 %v1457_v29  ;;  %v1401_v56 = vpack.c.bf16 %v184_v54, %v183_v53  ;;  %v185_v58 = vld [vmem:[#allocation6 + $0x40] sm:$0xff]  ;;  %v186_v59 = vld [vmem:[#allocation6 + $0x48] sm:$0xff]  ;;  %v187_v61 = vld [vmem:[#allocation6 + $0x50] sm:$0xff] }
  0x45   :  { %1462 = vmatprep.subr.bf16.mxu1 %v1461_v35  ;;  %v1405_v60 = vpack.c.bf16 %v186_v59, %v185_v58  ;;  %v188_v62 = vld [vmem:[#allocation6 + $0x58] sm:$0xff]  ;;  %v189_v0 = vld [vmem:[#allocation6 + $0x60] sm:$0xff]  ;;  %v190_v1 = vld [vmem:[#allocation6 + $0x68] sm:$0xff]  ;;  %v1697_v59 = vmov 0.0  }
  0x46   :  { %1372 = vmatpush3.bf16.msra.mxu0 %v1369_v12  ;;  %v1409_v63 = vpack.c.bf16 %v188_v62, %v187_v61  ;;  %v1413_v2 = vpack.c.bf16 %v190_v1, %v189_v0  ;;  %v191_v3 = vld [vmem:[#allocation6 + $0x70] sm:$0xff]  ;;  %v192_v4 = vld [vmem:[#allocation6 + $0x78] sm:$0xff]  ;;  %v413_v6 = vld [vmem:[#allocation6 + $0x100] sm:$0xff]  ;;  %555 = vst [vmem:[#allocation2] sm:$0xff] %v1697_v59 }
  0x47   :  { %1374 = vmatprep.subr.bf16.mxu0 %v1373_v15  ;;  %v1417_v5 = vpack.c.bf16 %v192_v4, %v191_v3  ;;  %v414_v7 = vld [vmem:[#allocation6 + $0x108] sm:$0xff]  ;;  %v415_v10 = vld [vmem:[#allocation6 + $0x110] sm:$0xff]  ;;  %v416_v11 = vld [vmem:[#allocation6 + $0x118] sm:$0xff]  ;;  %556 = vst [vmem:[#allocation2 + $0x38] sm:$0xff] %v1697_v59 }
  0x48   :  { %1464 = vmatpush3.bf16.msra.mxu1 %v1461_v35  ;;  %v1421_v8 = vpack.c.bf16 %v414_v7, %v413_v6  ;;  %v172_v12 = vld [vmem:[#allocation3 + $0xf] sm:$0xff]  ;;  %v1425_v13 = vpack.c.bf16 %v416_v11, %v415_v10  ;;  %v173_v14 = vld [vmem:[#allocation3 + $0x17] sm:$0xff]  ;;  %v174_v17 = vld [vmem:[#allocation3 + $0x1f] sm:$0xff] }
  0x49   :  { %1466 = vmatprep.subr.bf16.mxu1 %v1465_v41  ;;  %v418_v16 = vld [vmem:[#allocation6 + $0x128] sm:$0xff]  ;;  %v419_v20 = vld [vmem:[#allocation6 + $0x130] sm:$0xff]  ;;  %v421_v25 = vld [vmem:[#allocation6 + $0x140] sm:$0xff] }
  0x4a   :  { %1376 = vmatpush3.bf16.msra.mxu0 %v1373_v15  ;;  %v417_v15 = vld [vmem:[#allocation6 + $0x120] sm:$0xff]  ;;  %v176_v22 = vld [vmem:[#allocation3 + $0x2f] sm:$0xff]  ;;  %v424_v29 = vld [vmem:[#allocation6 + $0x158] sm:$0xff] }
  0x4b   :  { %1378 = vmatprep.subr.bf16.mxu0 %v1377_v18  ;;  %v175_v19 = vld [vmem:[#allocation3 + $0x27] sm:$0xff]  ;;  %v423_v28 = vld [vmem:[#allocation6 + $0x150] sm:$0xff]  ;;  %v428_v35 = vld [vmem:[#allocation6 + $0x178] sm:$0xff] }
  0x4c   :  { %1468 = vmatpush3.bf16.msra.mxu1 %v1465_v41  ;;  %v406_v24 = vld [vmem:[#allocation3 + $0x9] sm:$0xff]  ;;  %v1441_v30 = vpack.c.bf16 %v424_v29, %v423_v28  ;;  %v425_v31 = vld [vmem:[#allocation6 + $0x160] sm:$0xff]  ;;  %v407_v37 = vld [vmem:[#allocation3 + $0x11] sm:$0xff] }
  0x4d   :  { %1470 = vmatprep.subr.bf16.mxu1 %v1469_v49  ;;  %v422_v26 = vld [vmem:[#allocation6 + $0x148] sm:$0xff]  ;;  %v427_v34 = vld [vmem:[#allocation6 + $0x170] sm:$0xff]  ;;  %v603_v44 = vld [vmem:[#allocation8 + $0xd8] sm:$0xff] }
  0x4e   :  { %1380 = vmatpush3.bf16.msra.mxu0 %v1377_v18  ;;  %v1429_v18 = vpack.c.bf16 %v418_v16, %v417_v15  ;;  %v1437_v27 = vpack.c.bf16 %v422_v26, %v421_v25  ;;  %v1449_v36 = vpack.c.bf16 %v428_v35, %v427_v34  ;;  %v409_v39 = vld [vmem:[#allocation3 + $0x21] sm:$0xff]  ;;  %v410_v40 = vld [vmem:[#allocation3 + $0x29] sm:$0xff]  ;;  %v411_v41 = vld [vmem:[#allocation3 + $0x31] sm:$0xff] }
  0x4f   :  { %1382 = vmatprep.subr.bf16.mxu0 %v1381_v21  ;;  %v602_v43 = vld [vmem:[#allocation8 + $0xd0] sm:$0xff]  ;;  %v604_v47 = vld [vmem:[#allocation8 + $0xe0] sm:$0xff]  ;;  %v605_v48 = vld [vmem:[#allocation8 + $0xe8] sm:$0xff] }
  0x50   :  { %1472 = vmatpush3.bf16.msra.mxu1 %v1469_v49  ;;  %v1477_v49 = vpack.c.bf16 %v605_v48, %v604_v47  ;;  %v607_v53 = vld [vmem:[#allocation8 + $0xf8] sm:$0xff] }
  0x52   :  { %1384 = vmatpush3.bf16.msra.mxu0 %v1381_v21  ;;  %v420_v21 = vld [vmem:[#allocation6 + $0x138] sm:$0xff] }
  0x53   :  { %1386 = vmatprep.subr.bf16.mxu0 %v1385_v32  ;;  %v1433_v23 = vpack.c.bf16 %v420_v21, %v419_v20 }
  0x56   :  { %1388 = vmatpush3.bf16.msra.mxu0 %v1385_v32  ;;  %v426_v32 = vld [vmem:[#allocation6 + $0x168] sm:$0xff] }
  0x57   :  { %1390 = vmatprep.subr.bf16.mxu0 %v1389_v38  ;;  %v1445_v33 = vpack.c.bf16 %v426_v32, %v425_v31 }
  0x59   :  { %1144 = vmatmul.mubr.f32.vlgmr.msra.gmra.mrb[0].mxu0 %v1784_v42 }
  0x5a   :  { %1392 = vmatpush3.bf16.msra.mxu0 %v1389_v38  ;;  %1146 = vmatprep.mubr.f32.mxu0 %v1786_v46  ;;  %v408_v38 = vld [vmem:[#allocation3 + $0x19] sm:$0xff] }
  0x5b   :  { %1394 = vmatprep.subr.bf16.mxu0 %v1393_v45 }
  0x5d   :  { %1147 = vmatmul.mubr.f32.gmra.mrb[2].mxu0 %v1790_v50 }
  0x5e   :  { %1396 = vmatpush3.bf16.msra.mxu0 %v1393_v45  ;;  %1149 = vmatprep.mubr.f32.mxu0 %v1792_v52  ;;  %v1473_v45 = vpack.c.bf16 %v603_v44, %v602_v43  ;;  %v583_v44 = vld [vmem:[#allocation8 + $0x70] sm:$0xff] }
  0x5f   :  { %1398 = vmatprep.subr.bf16.mxu0 %v1397_v51 }
  0x60   :  { %1474 = vmatprep.subr.bf16.mxu1 %v1473_v45 }
  0x61   :  { %1150 = vmatmul.mubr.f32.gmra.mrb[4].mxu0 %v1796_v55  ;;  %1476 = vmatpush3.bf16.msra.mxu1 %v1473_v45 }
  0x62   :  { %1400 = vmatpush3.bf16.msra.mxu0 %v1397_v51  ;;  %1184 = vmatprep.mubr.f32.mxu0 %v171_v57  ;;  %v606_v51 = vld [vmem:[#allocation8 + $0xf0] sm:$0xff]  ;;  %v570_v57 = vld [vmem:[#allocation8 + $0x8] sm:$0xff] }
  0x63   :  { %1402 = vmatprep.subr.bf16.mxu0 %v1401_v56  ;;  %1478 = vmatprep.subr.bf16.mxu1 %v1477_v49  ;;  %v1481_v54 = vpack.c.bf16 %v607_v53, %v606_v51 }
  0x65   :  { %1480 = vmatpush3.bf16.msra.mxu1 %v1477_v49  ;;  %v806_v49 = vld [vmem:[#allocation8 + $0x108] sm:$0xff] }
  0x66   :  { %1404 = vmatpush3.bf16.msra.mxu0 %v1401_v56  ;;  %v569_v56 = vld [vmem:[#allocation8] sm:$0xff]  ;;  %1482 = vmatprep.subr.bf16.mxu1 %v1481_v54 }
  0x67   :  { %1406 = vmatprep.subr.bf16.mxu0 %v1405_v60  ;;  %v1799_v58 = vpack.c.bf16 %v570_v57, %v569_v56 }
  0x69   :  { %1484 = vmatpush3.bf16.msra.mxu1 %v1481_v54 }
  0x6a   :  { %1408 = vmatpush3.bf16.msra.mxu0 %v1405_v60  ;;  %1486 = vmatprep.subr.bf16.mxu1 %v1799_v58  ;;  %v62_v60 = vlaneseq }
  0x6b   :  { %1410 = vmatprep.subr.bf16.mxu0 %v1409_v63 }
  0x6c   :  { %v63_v61 = vshrl.u32 %v62_v60, 7  ;;  %v571_v60 = vld [vmem:[#allocation8 + $0x10] sm:$0xff] }
  0x6e   :  { %1412 = vmatpush3.bf16.msra.mxu0 %v1409_v63  ;;  %v64_v62 = vadd.s32 8, %v63_v61  ;;  %v66_v1 = vadd.s32 24, %v63_v61  ;;  %v65_v4 = vadd.s32 16, %v63_v61  ;;  %v68_v7 = vadd.s32 40, %v63_v61 }
  0x6f   :  { %1414 = vmatprep.subr.bf16.mxu0 %v1413_v2  ;;  %v67_v11 = vadd.s32 32, %v63_v61 }
  0x70   :  { %v1802_v63 = vmul.u32.u64.low 2863311531, %v64_v62  ;;  %v1803_v0 = vmul.u32.u64.high 2863311531, %v64_v62, %v1802_v63 }
  0x72   :  { %1416 = vmatpush3.bf16.msra.mxu0 %v1413_v2  ;;  %v1805_v2 = vmul.u32.u64.low 2863311531, %v63_v61  ;;  %v1806_v3 = vmul.u32.u64.high 2863311531, %v63_v61, %v1805_v2 }
  0x73   :  { %1418 = vmatprep.subr.bf16.mxu0 %v1417_v5 }
  0x74   :  { %v75_v15 = vshrl.u32 %v1806_v3, 4 }
  0x76   :  { %1420 = vmatpush3.bf16.msra.mxu0 %v1417_v5  ;;  %v1808_v5 = vmul.u32.u64.low 2863311531, %v66_v1  ;;  %v1809_v6 = vmul.u32.u64.high 2863311531, %v66_v1, %v1808_v5  ;;  %v76_v20 = vmul.u32 24, %v75_v15  ;;  %v573_v15 = vld [vmem:[#allocation8 + $0x20] sm:$0xff] }
  0x77   :  { %1422 = vmatprep.subr.bf16.mxu0 %v1421_v8 }
  0x78   :  { %v77_v25 = vsub.s32 %v63_v61, %v76_v20  ;;  %v572_v61 = vld [vmem:[#allocation8 + $0x18] sm:$0xff] }
  0x79   :  { %1185 = vmatmul.mubr.f32.vlgmr.msra.gmra.mrb[0].mxu0 %v172_v12  ;;  %v86_v12 = vshrl.u32 %v1803_v0, 4 }
  0x7a   :  { %1424 = vmatpush3.bf16.msra.mxu0 %v1421_v8  ;;  %1187 = vmatprep.mubr.f32.mxu0 %v173_v14  ;;  %v1811_v8 = vmul.u32.u64.low 2863311531, %v65_v4  ;;  %v1812_v10 = vmul.u32.u64.high 2863311531, %v65_v4, %v1811_v8  ;;  %vm135_vm2 = vcmp.ne.s32.totalorder %v77_v25, 0  ;;  %vm141_vm3 = vcmp.lt.s32.totalorder %v77_v25, 0 }
  0x7b   :  { %1426 = vmatprep.subr.bf16.mxu0 %v1425_v13  ;;  %v153_v34 = vadd.s32 24, %v77_v25  ;;  %vm1830_vm5 = vmand %vm141_vm3, %vm135_vm2 }
  0x7c   :  { %v97_v21 = vshrl.u32 %v1812_v10, 4 }
  0x7d   :  { %1188 = vmatmul.mubr.f32.gmra.mrb[2].mxu0 %v174_v17  ;;  %v1819_v16 = vmul.u32.u64.low 2863311531, %v67_v11  ;;  %v1820_v17 = vmul.u32.u64.high 2863311531, %v67_v11, %v1819_v16  ;;  %v159_v43 = vsel %vm1830_vm5, %v153_v34, %v77_v25  ;;  %v578_v34 = vld [vmem:[#allocation8 + $0x48] sm:$0xff] }
  0x7e   :  { %1428 = vmatpush3.bf16.msra.mxu0 %v1425_v13  ;;  %1190 = vmatprep.mubr.f32.mxu0 %v175_v19  ;;  %v1815_v13 = vmul.u32.u64.low 2863311531, %v68_v7  ;;  %v1816_v14 = vmul.u32.u64.high 2863311531, %v68_v7, %v1815_v13  ;;  %v108_v19 = vshrl.u32 %v1809_v6, 4  ;;  %v98_v26 = vmul.u32 24, %v97_v21  ;;  %v574_v16 = vld [vmem:[#allocation8 + $0x28] sm:$0xff] }
  0x7f   :  { %1430 = vmatprep.subr.bf16.mxu0 %v1429_v18  ;;  %v814_v6 = vld [vmem:[#allocation8 + $0x148] sm:$0xff]  ;;  %v817_v13 = vld [vmem:[#allocation8 + $0x160] sm:$0xff] }
  0x81   :  { %1191 = vmatmul.mubr.f32.gmra.mrb[4].mxu0 %v176_v22 }
  0x82   :  { %1432 = vmatpush3.bf16.msra.mxu0 %v1429_v18  ;;  %1225 = vmatprep.mubr.f32.mxu0 %v406_v24  ;;  %v87_v18 = vmul.u32 24, %v86_v12  ;;  %v130_v24 = vshrl.u32 %v1816_v14, 4 }
  0x83   :  { %1434 = vmatprep.subr.bf16.mxu0 %v1433_v23 }
  0x84   :  { %v88_v22 = vsub.s32 %v64_v62, %v87_v18  ;;  %v131_v29 = vmul.u32 24, %v130_v24  ;;  %v978_v24 = vld [vmem:[%s1937_s4] ss:$0 sm:$0xff]  ;;  %s1698_s4 = smov [#allocation9]  }
  0x85   :  { %s964_s8 = sshll.u32 %s1698_s4, 4  ;;  %s965_s8 = int_to_ptr.vmem [resolvable:$true] %s964_s8 }
  0x86   :  { %1436 = vmatpush3.bf16.msra.mxu0 %v1433_v23  ;;  %v109_v23 = vmul.u32 24, %v108_v19  ;;  %vm136_vm0 = vcmp.ne.s32.totalorder %v88_v22, 0  ;;  %vm142_vm1 = vcmp.lt.s32.totalorder %v88_v22, 0  ;;  %v154_v32 = vadd.s32 24, %v88_v22  ;;  %s1664_s9 = scalar_lea.vmem %s965_s8, 768  ;;  %p1669_p11 = scmp.lt.s32.totalorder %s965_s8, %s965_s8 }
  0x87   :  { %1438 = vmatprep.subr.bf16.mxu0 %v1437_v27  ;;  %vm1826_vm4 = vmand %vm142_vm1, %vm136_vm0  ;;  %vm1853_vm1 = vcmp.lt.s32.totalorder %v159_v43, 16  ;;  %p1665_p10 = scmp.ne.s32.totalorder %s965_s8, %s1664_s9  ;;  %p1670_p12 = scmp.lt.s32.totalorder %s1664_s9, %s1664_s9 }
  0x88   :  { %v110_v28 = vsub.s32 %v66_v1, %v109_v23  ;;  %v812_v1 = vld [vmem:[#allocation8 + $0x138] sm:$0xff] }
  0x89   :  { %p1671_p13 = por %p1670_p12, %p1669_p11 }
  0x8a   :  { %1440 = vmatpush3.bf16.msra.mxu0 %v1437_v27  ;;  %v119_v27 = vshrl.u32 %v1820_v17, 4  ;;  %vm138_vm6 = vcmp.ne.s32.totalorder %v110_v28, 0  ;;  %vm144_vm7 = vcmp.lt.s32.totalorder %v110_v28, 0 }
  0x8b   :  { %1442 = vmatprep.subr.bf16.mxu0 %v1441_v30  ;;  %vm1841_vm10 = vmand %vm144_vm7, %vm138_vm6  ;;  %p1672_p0 = pnand %p1671_p13, %p1665_p10 }
  0x8c   :  { %v120_v31 = vmul.u32 24, %v119_v27 }
  0x8e   :  { %1444 = vmatpush3.bf16.msra.mxu0 %v1441_v30  ;;  %v99_v30 = vsub.s32 %v65_v4, %v98_v26  ;;  %v1493_v26 = vpack.c.bf16 %v574_v16, %v573_v15  ;;  %v819_v16 = vld [vmem:[#allocation8 + $0x170] sm:$0xff] }
  0x8f   :  { %1446 = vmatprep.subr.bf16.mxu0 %v1445_v33 }
  0x90   :  { %vm137_vm8 = vcmp.ne.s32.totalorder %v99_v30, 0  ;;  %vm143_vm9 = vcmp.lt.s32.totalorder %v99_v30, 0  ;;  %v155_v45 = vadd.s32 24, %v99_v30 }
  0x91   :  { %vm1845_vm11 = vmand %vm143_vm9, %vm137_vm8 }
  0x92   :  { %1448 = vmatpush3.bf16.msra.mxu0 %v1445_v33  ;;  %v161_v0 = vsel %vm1845_vm11, %v155_v45, %v99_v30  ;;  %v577_v33 = vld [vmem:[#allocation8 + $0x40] sm:$0xff]  ;;  %v584_v45 = vld [vmem:[#allocation8 + $0x78] sm:$0xff] }
  0x93   :  { %1450 = vmatprep.subr.bf16.mxu0 %v1449_v36  ;;  %vm1880_vm5 = vcmp.lt.s32.totalorder %v161_v0, 16  ;;  %v811_v0 = vld [vmem:[#allocation8 + $0x130] sm:$0xff] }
  0x96   :  { %1452 = vmatpush3.bf16.msra.mxu0 %v1449_v36  ;;  %v132_v36 = vsub.s32 %v68_v7, %v131_v29  ;;  %v576_v29 = vld [vmem:[#allocation8 + $0x38] sm:$0xff] }
  0x98   :  { %vm140_vm12 = vcmp.ne.s32.totalorder %v132_v36, 0  ;;  %vm146_vm13 = vcmp.lt.s32.totalorder %v132_v36, 0  ;;  %v158_v59 = vadd.s32 24, %v132_v36 }
  0x99   :  { %1226 = vmatmul.mubr.f32.vlgmr.msra.gmra.mrb[0].mxu0 %v407_v37  ;;  %v977_v37 = vld [vmem:[%s1936_s3] ss:$0 sm:$0xff]  ;;  %vm1862_vm2 = vmand %vm146_vm13, %vm140_vm12 }
  0x9a   :  { %1228 = vmatprep.mubr.f32.mxu0 %v408_v38  ;;  %v121_v38 = vsub.s32 %v67_v11, %v120_v31  ;;  %v1489_v11 = vpack.c.bf16 %v572_v61, %v571_v60  ;;  %v164_v14 = vsel %vm1862_vm2, %v158_v59, %v132_v36  ;;  %v1501_v36 = vpack.c.bf16 %v578_v34, %v577_v33  ;;  %v809_v59 = vld [vmem:[#allocation8 + $0x120] sm:$0xff]  ;;  %v810_v60 = vld [vmem:[#allocation8 + $0x128] sm:$0xff] }
  0x9b   :  { %vm1897_vm6 = vcmp.lt.s32.totalorder %v164_v14, 16  ;;  %v818_v14 = vld [vmem:[#allocation8 + $0x168] sm:$0xff] }
  0x9c   :  { %vm139_vm15 = vcmp.ne.s32.totalorder %v121_v38, 0  ;;  %vm145_vm0 = vcmp.lt.s32.totalorder %v121_v38, 0  ;;  %v157_v2 = vadd.s32 24, %v121_v38  ;;  %v1541_v15 = vpack.c.bf16 %v818_v14, %v817_v13 }
  0x9d   :  { %1229 = vmatmul.mubr.f32.gmra.mrb[2].mxu0 %v409_v39  ;;  %v160_v39 = vsel %vm1826_vm4, %v154_v32, %v88_v22  ;;  %vm1870_vm3 = vmand %vm145_vm0, %vm139_vm15 }
  0x9e   :  { %1231 = vmatprep.mubr.f32.mxu0 %v410_v40  ;;  %v156_v40 = vadd.s32 24, %v110_v28  ;;  %vm1849_vm14 = vcmp.lt.s32.totalorder %v160_v39, 16  ;;  %v163_v19 = vsel %vm1870_vm3, %v157_v2, %v121_v38  ;;  %v580_v38 = vld [vmem:[#allocation8 + $0x58] sm:$0xff] }
  0x9f   :  { %vm169_vm7 = vcmp.lt.s32.totalorder %v163_v19, 16 }
  0xa0   :  { %v162_v57 = vsel %vm1841_vm10, %v156_v40, %v110_v28  ;;  %v575_v28 = vld [vmem:[#allocation8 + $0x30] sm:$0xff]  ;;  %v581_v40 = vld [vmem:[#allocation8 + $0x60] sm:$0xff] }
  0xa1   :  { %1232 = vmatmul.mubr.f32.gmra.mrb[4].mxu0 %v411_v41  ;;  %vm1876_vm4 = vcmp.lt.s32.totalorder %v162_v57, 16  ;;  %v1497_v32 = vpack.c.bf16 %v576_v29, %v575_v28 }
 0x16c   :  { %v1227_v41 = vpop.f32.mrb[0].mxu0 }
 0x16d   :  { %v538_v47 = vadd.f32 %v1227_v41, %v977_v37  ;;  %v495_v48 = vpop.f32.mrb[1].mxu0  ;;  %v582_v41 = vld [vmem:[#allocation8 + $0x68] sm:$0xff] }
 0x16e   :  { %v537_v53 = vadd.f32 %v977_v37, %v495_v48  ;;  %v1509_v43 = vpack.c.bf16 %v582_v41, %v581_v40  ;;  %v805_v48 = vld [vmem:[#allocation8 + $0x100] sm:$0xff] }
 0x16f   :  { %v544_v54 = vmax.f32 %v538_v47, 0.0  ;;  %v1513_v47 = vpack.c.bf16 %v584_v45, %v583_v44  ;;  %v1517_v51 = vpack.c.bf16 %v806_v49, %v805_v48 }
 0x170   :  { %v543_v62 = vmax.f32 %v537_v53, 0.0  ;;  %v1230_v63 = vpop.f32.mrb[2].mxu0  ;;  %v807_v53 = vld [vmem:[#allocation8 + $0x110] sm:$0xff] }
 0x171   :  { %v550_v3 = vsel %vm1849_vm14, %v544_v54, 0.0  ;;  %v540_v4 = vadd.f32 %v1230_v63, %v977_v37  ;;  %v505_v5 = vpop.f32.mrb[3].mxu0 }
 0x172   :  { %558 = vst [vmem:[#allocation2 + $0x10] sm:$0xff] %v550_v3  ;;  %v549_v7 = vsel %vm1853_vm1, %v543_v62, 0.0  ;;  %v539_v10 = vadd.f32 %v977_v37, %v505_v5  ;;  %1592 = vmatprep.mubr.msk.f32.mxu1 %vm1853_vm1, %v543_v62  ;;  %v1525_v62 = vpack.c.bf16 %v810_v60, %v809_v59  ;;  %v1529_v3 = vpack.c.bf16 %v812_v1, %v811_v0  ;;  %v813_v5 = vld [vmem:[#allocation8 + $0x140] sm:$0xff] }
 0x173   :  { %557 = vst [vmem:[#allocation2 + $0x8] sm:$0xff] %v549_v7  ;;  %v546_v12 = vmax.f32 %v540_v4, 0.0  ;;  %1593 = vmatmul.mubr.msk.f32.vlgmr.msra.gmra.mrb[0].mxu1 %vm1849_vm14, %v544_v54  ;;  %v808_v54 = vld [vmem:[#allocation8 + $0x118] sm:$0xff]  ;;  %v1533_v8 = vpack.c.bf16 %v814_v6, %v813_v5 }
 0x174   :  { %v545_v17 = vmax.f32 %v539_v10, 0.0  ;;  %v1233_v18 = vpop.f32.mrb[4].mxu0  ;;  %1488 = vmatpush3.bf16.msra.mxu1 %v1799_v58  ;;  %v1521_v56 = vpack.c.bf16 %v808_v54, %v807_v53  ;;  %v815_v10 = vld [vmem:[#allocation8 + $0x150] sm:$0xff] }
 0x175   :  { %v552_v20 = vsel %vm1876_vm4, %v546_v12, 0.0  ;;  %v542_v21 = vadd.f32 %v1233_v18, %v977_v37  ;;  %v515_v22 = vpop.f32.mrb[5].mxu0  ;;  %1490 = vmatprep.subr.bf16.mxu1 %v1489_v11 }
 0x176   :  { %560 = vst [vmem:[#allocation2 + $0x20] sm:$0xff] %v552_v20  ;;  %v551_v23 = vsel %vm1880_vm5, %v545_v17, 0.0  ;;  %v541_v25 = vadd.f32 %v977_v37, %v515_v22  ;;  %1594 = vmatprep.mubr.msk.f32.mxu1 %vm1880_vm5, %v545_v17  ;;  %v579_v37 = vld [vmem:[#allocation8 + $0x50] sm:$0xff]  ;;  %v820_v17 = vld [vmem:[#allocation8 + $0x178] sm:$0xff] }
 0x177   :  { %559 = vst [vmem:[#allocation2 + $0x18] sm:$0xff] %v551_v23  ;;  %v548_v27 = vmax.f32 %v542_v21, 0.0  ;;  %1595 = vmatmul.mubr.msk.f32.gmra.mrb[2].mxu1 %vm1876_vm4, %v546_v12  ;;  %v1505_v39 = vpack.c.bf16 %v580_v38, %v579_v37  ;;  %v1545_v18 = vpack.c.bf16 %v820_v17, %v819_v16 }
 0x178   :  { %v547_v58 = vmax.f32 %v541_v25, 0.0  ;;  %1492 = vmatpush3.bf16.msra.mxu1 %v1489_v11  ;;  %v816_v11 = vld [vmem:[#allocation8 + $0x158] sm:$0xff] }
 0x179   :  { %v554_v30 = vsel %vm1897_vm6, %v548_v27, 0.0  ;;  %1494 = vmatprep.subr.bf16.mxu1 %v1493_v26  ;;  %v1537_v12 = vpack.c.bf16 %v816_v11, %v815_v10 }
 0x17a   :  { %562 = vst [vmem:[#allocation2 + $0x30] sm:$0xff] %v554_v30  ;;  %v553_v31 = vsel %vm169_vm7, %v547_v58, 0.0  ;;  %1596 = vmatprep.mubr.msk.f32.mxu1 %vm169_vm7, %v547_v58  ;;  %v563_v35 = vld [vmem:[#allocation2 + $0x7] sm:$0xff]  ;;  %v564_v57 = vld [vmem:[#allocation2 + $0xf] sm:$0xff] }
 0x17b   :  { %561 = vst [vmem:[#allocation2 + $0x28] sm:$0xff] %v553_v31  ;;  %1597 = vmatmul.mubr.msk.f32.gmra.mrb[4].mxu1 %vm1897_vm6, %v548_v27  ;;  %v798_v7 = vld [vmem:[#allocation2 + $0x9] sm:$0xff] }
 0x17c   :  { %1496 = vmatpush3.bf16.msra.mxu1 %v1493_v26  ;;  %1307 = vmatprep.mubr.f32.mxu1 %v563_v35 }
 0x17d   :  { %1498 = vmatprep.subr.bf16.mxu1 %v1497_v32 }
 0x17e   :  { %v565_v61 = vld [vmem:[#allocation2 + $0x17] sm:$0xff]  ;;  %v566_v63 = vld [vmem:[#allocation2 + $0x1f] sm:$0xff] }
 0x17f   :  { %v799_v19 = vld [vmem:[#allocation2 + $0x11] sm:$0xff]  ;;  %v800_v20 = vld [vmem:[#allocation2 + $0x19] sm:$0xff] }
 0x180   :  { %1500 = vmatpush3.bf16.msra.mxu1 %v1497_v32 }
 0x181   :  { %1502 = vmatprep.subr.bf16.mxu1 %v1501_v36  ;;  %v803_v23 = vld [vmem:[#allocation2 + $0x31] sm:$0xff] }
 0x182   :  { %v567_v2 = vld [vmem:[#allocation2 + $0x27] sm:$0xff]  ;;  %v568_v4 = vld [vmem:[#allocation2 + $0x2f] sm:$0xff] }
 0x183   :  { %v801_v21 = vld [vmem:[#allocation2 + $0x21] sm:$0xff]  ;;  %v802_v22 = vld [vmem:[#allocation2 + $0x29] sm:$0xff] }
 0x184   :  { %1504 = vmatpush3.bf16.msra.mxu1 %v1501_v36 }
 0x185   :  { %1506 = vmatprep.subr.bf16.mxu1 %v1505_v39 }
 0x188   :  { %1508 = vmatpush3.bf16.msra.mxu1 %v1505_v39 }
 0x189   :  { %1510 = vmatprep.subr.bf16.mxu1 %v1509_v43 }
 0x18c   :  { %1512 = vmatpush3.bf16.msra.mxu1 %v1509_v43 }
 0x18d   :  { %1514 = vmatprep.subr.bf16.mxu1 %v1513_v47 }
 0x190   :  { %1516 = vmatpush3.bf16.msra.mxu1 %v1513_v47 }
 0x191   :  { %1518 = vmatprep.subr.bf16.mxu1 %v1517_v51 }
 0x193   :  { %1308 = vmatmul.mubr.f32.vlgmr.msra.gmra.mrb[0].mxu1 %v564_v57 }
 0x194   :  { %1310 = vmatprep.mubr.f32.mxu1 %v565_v61  ;;  %1520 = vmatpush3.bf16.msra.mxu1 %v1517_v51 }
 0x195   :  { %1522 = vmatprep.subr.bf16.mxu1 %v1521_v56 }
 0x197   :  { %1311 = vmatmul.mubr.f32.gmra.mrb[2].mxu1 %v566_v63 }
 0x198   :  { %1313 = vmatprep.mubr.f32.mxu1 %v567_v2  ;;  %1524 = vmatpush3.bf16.msra.mxu1 %v1521_v56 }
 0x199   :  { %1526 = vmatprep.subr.bf16.mxu1 %v1525_v62 }
 0x19b   :  { %1314 = vmatmul.mubr.f32.gmra.mrb[4].mxu1 %v568_v4 }
 0x19c   :  { %1528 = vmatpush3.bf16.msra.mxu1 %v1525_v62  ;;  %1348 = vmatprep.mubr.f32.mxu1 %v798_v7 }
 0x19d   :  { %1530 = vmatprep.subr.bf16.mxu1 %v1529_v3 }
 0x1a0   :  { %1532 = vmatpush3.bf16.msra.mxu1 %v1529_v3 }
 0x1a1   :  { %1534 = vmatprep.subr.bf16.mxu1 %v1533_v8 }
 0x1a4   :  { %1536 = vmatpush3.bf16.msra.mxu1 %v1533_v8 }
 0x1a5   :  { %1538 = vmatprep.subr.bf16.mxu1 %v1537_v12 }
 0x1a8   :  { %1540 = vmatpush3.bf16.msra.mxu1 %v1537_v12 }
 0x1a9   :  { %1542 = vmatprep.subr.bf16.mxu1 %v1541_v15 }
 0x1ac   :  { %1544 = vmatpush3.bf16.msra.mxu1 %v1541_v15 }
 0x1ad   :  { %1546 = vmatprep.subr.bf16.mxu1 %v1545_v18 }
 0x1b0   :  { %1548 = vmatpush3.bf16.msra.mxu1 %v1545_v18 }
 0x1b3   :  { %1349 = vmatmul.mubr.f32.vlgmr.msra.gmra.mrb[0].mxu1 %v799_v19 }
 0x1b4   :  { %1351 = vmatprep.mubr.f32.mxu1 %v800_v20 }
 0x1b7   :  { %1352 = vmatmul.mubr.f32.gmra.mrb[2].mxu1 %v801_v21 }
 0x1b8   :  { %1354 = vmatprep.mubr.f32.mxu1 %v802_v22 }
 0x1bb   :  { %1355 = vmatmul.mubr.f32.gmra.mrb[4].mxu1 %v803_v23 }
 0x286   :  { %v1350_v25 = vpop.f32.mrb[0].mxu1 }
 0x287   :  { %v930_v26 = vadd.f32 %v1350_v25, %v978_v24  ;;  %v887_v27 = vpop.f32.mrb[1].mxu1 }
 0x288   :  { %v929_v28 = vadd.f32 %v978_v24, %v887_v27 }
 0x289   :  { %v942_v29 = vadd.f32 %v930_v26, %v1784_v42 }
 0x28a   :  { %v941_v58 = vadd.f32 %v929_v28, %v1781_v9  ;;  %v1353_v30 = vpop.f32.mrb[2].mxu1 }
 0x28b   :  { %v948_v31 = vmax.f32 %v942_v29, 0.0  ;;  %v932_v32 = vadd.f32 %v1353_v30, %v978_v24  ;;  %v897_v33 = vpop.f32.mrb[3].mxu1 }
 0x28c   :  { %v947_v34 = vmax.f32 %v941_v58, 0.0  ;;  %v931_v35 = vadd.f32 %v978_v24, %v897_v33 }
 0x28d   :  { %954 = vst [vmem:[#allocation9 + $0x8] sm:$0xff] %v948_v31  ;;  %v944_v36 = vadd.f32 %v932_v32, %v1790_v50 }
 0x28e   :  { %953 = vst [vmem:[#allocation9] sm:$0xff] %v947_v34  ;;  %v943_v37 = vadd.f32 %v931_v35, %v1786_v46  ;;  %v1356_v38 = vpop.f32.mrb[4].mxu1 }
 0x28f   :  { %v950_v39 = vmax.f32 %v944_v36, 0.0  ;;  %v934_v40 = vadd.f32 %v1356_v38, %v978_v24  ;;  %v907_v41 = vpop.f32.mrb[5].mxu1 }
 0x290   :  { %v949_v43 = vmax.f32 %v943_v37, 0.0  ;;  %v933_v42 = vadd.f32 %v978_v24, %v907_v41 }
 0x291   :  { %956 = vst [vmem:[#allocation9 + $0x18] sm:$0xff] %v950_v39  ;;  %v946_v9 = vadd.f32 %v934_v40, %v1796_v55 }
 0x292   :  { %955 = vst [vmem:[#allocation9 + $0x10] sm:$0xff] %v949_v43  ;;  %v945_v44 = vadd.f32 %v933_v42, %v1792_v52 }
 0x293   :  { %v952_v45 = vmax.f32 %v946_v9, 0.0 }
 0x294   :  { %v951_v47 = vmax.f32 %v945_v44, 0.0 }
 0x295   :  { %958 = vst [vmem:[#allocation9 + $0x28] sm:$0xff] %v952_v45 }
 0x296   :  { %957 = vst [vmem:[#allocation9 + $0x20] sm:$0xff] %v951_v47 }
 0x297   :  { %1675 = shalt.err (!%p1672_p0)
}
 0x298   :  { %s1676_s12 = scalar_lea.hbm %s1938_s5, 768 }
 0x299   :  { %p1677_p1 = scmp.ne.s32.totalorder %s1938_s5, %s1676_s12  ;;  %p1680_p2 = scmp.lt.u32.totalorder %s1676_s12, %s1938_s5 }
 0x29b   :  { %p1682_p3 = pnand %p1680_p2, %p1677_p1 }
 0x29d   :  { %1685 = shalt.err (!%p1682_p3)
}
 0x29e   :  { %970 = dma.vmem_to_hbm [thread:$0]  %s965_s8, 768, %s1938_s5, [#allocation5], %s1694_s30, %s1694_s30, %s1695_s6  }
 0x29f   :  { %1690 = dma.done.wait [#allocation5], 768  }
 0x2a0   :  { %1691 = vsyncadd [#allocation5], 4294966528 }
 0x2a1   :  { %974 = vsyncpa [#allocation4], 1 }
 0x2a2   :  { %975 = vsyncpa [#allocation7], 1 }
 0x2a3   :  { %976 = vsyncpa [#allocation5], 1 }

</bundles_post_ra>
